<compile_context>
chip_gen: v6e
topology: v6e:2x2x1
jax: 0.10.0
libtpu: 0.0.40
codegen_flags: <defaults>
</compile_context>

<pallas_src>
import functools

import jax
import jax.numpy as jnp
from jax import lax
from jax.experimental import pallas as pl
from jax.experimental.pallas import tpu as pltpu


def _mlp_kernel(x_ref, w1_ref, b1_ref, w2_ref, b2_ref, w3_ref, b3_ref, o_ref):
    # x tile arrives in the natural [batch, feat] layout; contract its feature
    # axis directly (A @ B^T form) so no wrapper-side transpose/pad is needed.
    x = x_ref[...].astype(jnp.bfloat16)                                  # (tb, in)
    h = lax.dot_general(w1_ref[...], x, (((1,), (1,)), ((), ())),
                        preferred_element_type=jnp.float32)              # (hid, tb)
    h = jnp.maximum(h + b1_ref[...], 0.0).astype(jnp.bfloat16)
    h = jnp.dot(w2_ref[...], h, preferred_element_type=jnp.float32) + b2_ref[...]
    h = jnp.maximum(h, 0.0).astype(jnp.bfloat16)                         # (hid, tb)
    out = jnp.dot(w3_ref[...], h, preferred_element_type=jnp.float32) + b3_ref[...]
    o_ref[...] = out.astype(o_ref.dtype)                                 # (8,  tb)


def _cdiv(a, b):
    return -(-a // b)


def _round_up(n, m):
    return _cdiv(n, m) * m


@functools.partial(jax.jit, static_argnames=("block_b",))
def policy_net_forward(x, params, *, block_b=4096):
    """x: [B, input_dim] float32.  params: w1..b3 with weights in [out, in] layout,
    biases in [out, 1].  Returns [B, output_dim] float32."""
    w1, b1, w2, b2, w3, b3 = (params[k] for k in ("w1", "b1", "w2", "b2", "w3", "b3"))
    B, in_dim = x.shape
    hidden = w1.shape[0]
    out_dim = w3.shape[0]
    out_pad = _round_up(out_dim, 8)
    assert w1.shape[1] == in_dim

    # Batch tile: multiple of 128 lanes (correctness for any block_b), capped by
    # block_b, and split at least two ways when B allows so the 'parallel' grid
    # axis spans both v7x TensorCores.
    cap = max(128, _round_up(block_b, 128))
    tb = max(128, min(cap, _round_up(_cdiv(B, 2), 128)))
    n_tiles = _cdiv(B, tb)
    b_pad = n_tiles * tb            # output array is block-aligned -> no ragged writes

    # bf16 weights for single-pass MXU matmuls; biases and accumulation stay f32.
    w1b = w1.astype(jnp.bfloat16)
    w2b = w2.astype(jnp.bfloat16)
    w3b = jnp.zeros((out_pad, hidden), jnp.bfloat16).at[:out_dim].set(w3.astype(jnp.bfloat16))
    b3p = jnp.zeros((out_pad, 1), jnp.float32).at[:out_dim].set(b3)

    # Large batches feed straight in (ragged tail tiles are masked by Pallas);
    # only batches smaller than one tile get a (tiny) pad so the block never
    # exceeds the array extent.
    xin = x if B >= tb else jnp.pad(x, ((0, tb - B), (0, 0)))

    # Weights/biases: constant index_map -> resident in VMEM across the grid.
    resident = lambda shape: pl.BlockSpec(shape, lambda i: (0,) * len(shape))

    outT = pl.pallas_call(
        _mlp_kernel,
        out_shape=jax.ShapeDtypeStruct((out_pad, b_pad), jnp.float32),
        grid=(n_tiles,),
        in_specs=[
            pl.BlockSpec((tb, in_dim), lambda i: (i, 0)),   # x tile, pipelined over batch
            resident((hidden, in_dim)), resident((hidden, 1)),
            resident((hidden, hidden)), resident((hidden, 1)),
            resident((out_pad, hidden)), resident((out_pad, 1)),
        ],
        out_specs=pl.BlockSpec((out_pad, tb), lambda i: (0, i)),
        compiler_params=pltpu.CompilerParams(
            # Independent batch tiles -> shard across TensorCores on v7x.
            dimension_semantics=("parallel",),
        ),
    )(xin, w1b, b1, w2b, b2, w3b, b3p)

    # Only the tiny [out_pad, B] output is sliced/transposed back to PyTorch layout.
    return outT[:out_dim, :B].T


def init_params(key, input_dim=6, output_dim=6, hidden_size=64):
    """Deterministic init mimicking PyTorch nn.Linear default
    (U[-1/sqrt(fan_in), +1/sqrt(fan_in)]).  Weights kept in [out, in] layout."""
    def linear(k, fan_in, fan_out):
        kw, kb = jax.random.split(k)
        bound = 1.0 / jnp.sqrt(jnp.float32(fan_in))
        w = jax.random.uniform(kw, (fan_out, fan_in), jnp.float32, -bound, bound)
        b = jax.random.uniform(kb, (fan_out, 1), jnp.float32, -bound, bound)
        return w, b

    k1, k2, k3 = jax.random.split(key, 3)
    w1, b1 = linear(k1, input_dim, hidden_size)
    w2, b2 = linear(k2, hidden_size, hidden_size)
    w3, b3 = linear(k3, hidden_size, output_dim)
    return {"w1": w1, "b1": b1, "w2": w2, "b2": b2, "w3": w3, "b3": b3}


def _ref_forward(x, p):
    h1 = jnp.maximum(x @ p["w1"].T + p["b1"].T, 0.0)
    h2 = jnp.maximum(h1 @ p["w2"].T + p["b2"].T, 0.0)
    return h2 @ p["w3"].T + p["b3"].T


if __name__ == "__main__":
    key = jax.random.PRNGKey(0)
    k_param, k_x1, k_x2 = jax.random.split(key, 3)

    B, INPUT_DIM, OUTPUT_DIM, HIDDEN = 8, 6, 6, 64
    params = init_params(k_param, INPUT_DIM, OUTPUT_DIM, HIDDEN)

    # bf16 MXU inputs with f32 accumulation -> loosened tolerances vs f32 reference.
    TOL = dict(atol=2e-2, rtol=2e-2)

    # Small batch (single padded tile).
    x_small = jax.random.normal(k_x1, (B, INPUT_DIM), jnp.float32)
    out_small = jax.block_until_ready(policy_net_forward(x_small, params))
    ref_small = _ref_forward(x_small, params)
    assert out_small.shape == (B, OUTPUT_DIM)
    assert jnp.allclose(out_small, ref_small, **TOL)

    # Ragged batch with a multi-step grid (exercises masked tail reads + pipelining,
    # and a >= 2-tile 'parallel' grid).
    B2 = 200
    x_big = jax.random.normal(k_x2, (B2, INPUT_DIM), jnp.float32)
    out_big = jax.block_until_ready(policy_net_forward(x_big, params, block_b=128))
    ref_big = _ref_forward(x_big, params)
    assert out_big.shape == (B2, OUTPUT_DIM)
    assert jnp.allclose(out_big, ref_big, **TOL)

    print("KERNEL_OK")
</pallas_src>

<mosaic_0001>
module attributes {stable_mosaic.version = 11 : i64} {
  func.func @_mlp_kernel(%arg0: i32, %arg1: memref<128x6xf32, #tpu.memory_space<vmem>>, %arg2: memref<64x6xbf16, #tpu.memory_space<vmem>>, %arg3: memref<64x1xf32, #tpu.memory_space<vmem>>, %arg4: memref<64x64xbf16, #tpu.memory_space<vmem>>, %arg5: memref<64x1xf32, #tpu.memory_space<vmem>>, %arg6: memref<8x64xbf16, #tpu.memory_space<vmem>>, %arg7: memref<8x1xf32, #tpu.memory_space<vmem>>, %arg8: memref<8x128xf32, #tpu.memory_space<vmem>>) attributes {dimension_semantics = [#tpu.dimension_semantics<parallel>], iteration_bounds = array<i64: 1>, scalar_prefetch = 0 : i64, scratch_operands = 0 : i64, tpu.core_type = #tpu.core_type<tc>, window_params = [{transform_indices = @transform_0, window_bounds = array<i64: 128, 6>}, {pipeline_mode = #tpu.pipeline_mode<synchronous>, transform_indices = @transform_1, window_bounds = array<i64: 64, 6>}, {pipeline_mode = #tpu.pipeline_mode<synchronous>, transform_indices = @transform_2, window_bounds = array<i64: 64, 1>}, {pipeline_mode = #tpu.pipeline_mode<synchronous>, transform_indices = @transform_3, window_bounds = array<i64: 64, 64>}, {pipeline_mode = #tpu.pipeline_mode<synchronous>, transform_indices = @transform_4, window_bounds = array<i64: 64, 1>}, {pipeline_mode = #tpu.pipeline_mode<synchronous>, transform_indices = @transform_5, window_bounds = array<i64: 8, 64>}, {pipeline_mode = #tpu.pipeline_mode<synchronous>, transform_indices = @transform_6, window_bounds = array<i64: 8, 1>}, {transform_indices = @transform_7, window_bounds = array<i64: 8, 128>}]} {
    %c0 = arith.constant 0 : index
    %c0_0 = arith.constant 0 : index
    %0 = vector.load %arg1[%c0, %c0_0] : memref<128x6xf32, #tpu.memory_space<vmem>>, vector<128x6xf32>
    %1 = arith.truncf %0 : vector<128x6xf32> to vector<128x6xbf16>
    %c0_1 = arith.constant 0 : index
    %c0_2 = arith.constant 0 : index
    %2 = vector.load %arg2[%c0_1, %c0_2] : memref<64x6xbf16, #tpu.memory_space<vmem>>, vector<64x6xbf16>
    %cst = arith.constant dense<0.000000e+00> : vector<64x128xf32>
    %3 = tpu.matmul %2, %1, %cst {dimension_numbers = #tpu.dot_dimension_numbers<[1], [1], [0], [0], [0, 0, 1, 0], [], []>} : vector<64x6xbf16>, vector<128x6xbf16>, vector<64x128xf32> -> vector<64x128xf32>
    %c0_3 = arith.constant 0 : index
    %c0_4 = arith.constant 0 : index
    %4 = vector.load %arg3[%c0_3, %c0_4] : memref<64x1xf32, #tpu.memory_space<vmem>>, vector<64x1xf32>
    %5 = vector.broadcast %4 : vector<64x1xf32> to vector<64x128xf32>
    %6 = arith.addf %3, %5 : vector<64x128xf32>
    %cst_5 = arith.constant 0.000000e+00 : f32
    %7 = vector.broadcast %cst_5 : f32 to vector<64x128xf32>
    %8 = arith.maximumf %6, %7 : vector<64x128xf32>
    %9 = arith.truncf %8 : vector<64x128xf32> to vector<64x128xbf16>
    %c0_6 = arith.constant 0 : index
    %c0_7 = arith.constant 0 : index
    %10 = vector.load %arg4[%c0_6, %c0_7] : memref<64x64xbf16, #tpu.memory_space<vmem>>, vector<64x64xbf16>
    %cst_8 = arith.constant dense<0.000000e+00> : vector<64x128xf32>
    %11 = tpu.matmul %10, %9, %cst_8 {dimension_numbers = #tpu.dot_dimension_numbers<[1], [0], [0], [1], [0, 0, 1, 1], [], []>} : vector<64x64xbf16>, vector<64x128xbf16>, vector<64x128xf32> -> vector<64x128xf32>
    %c0_9 = arith.constant 0 : index
    %c0_10 = arith.constant 0 : index
    %12 = vector.load %arg5[%c0_9, %c0_10] : memref<64x1xf32, #tpu.memory_space<vmem>>, vector<64x1xf32>
    %13 = vector.broadcast %12 : vector<64x1xf32> to vector<64x128xf32>
    %14 = arith.addf %11, %13 : vector<64x128xf32>
    %cst_11 = arith.constant 0.000000e+00 : f32
    %15 = vector.broadcast %cst_11 : f32 to vector<64x128xf32>
    %16 = arith.maximumf %14, %15 : vector<64x128xf32>
    %17 = arith.truncf %16 : vector<64x128xf32> to vector<64x128xbf16>
    %c0_12 = arith.constant 0 : index
    %c0_13 = arith.constant 0 : index
    %18 = vector.load %arg6[%c0_12, %c0_13] : memref<8x64xbf16, #tpu.memory_space<vmem>>, vector<8x64xbf16>
    %cst_14 = arith.constant dense<0.000000e+00> : vector<8x128xf32>
    %19 = tpu.matmul %18, %17, %cst_14 {dimension_numbers = #tpu.dot_dimension_numbers<[1], [0], [0], [1], [0, 0, 1, 1], [], []>} : vector<8x64xbf16>, vector<64x128xbf16>, vector<8x128xf32> -> vector<8x128xf32>
    %c0_15 = arith.constant 0 : index
    %c0_16 = arith.constant 0 : index
    %20 = vector.load %arg7[%c0_15, %c0_16] : memref<8x1xf32, #tpu.memory_space<vmem>>, vector<8x1xf32>
    %21 = vector.broadcast %20 : vector<8x1xf32> to vector<8x128xf32>
    %22 = arith.addf %19, %21 : vector<8x128xf32>
    %c0_17 = arith.constant 0 : index
    %c0_18 = arith.constant 0 : index
    %23 = vector.load %arg8[%c0_17, %c0_18] : memref<8x128xf32, #tpu.memory_space<vmem>>, vector<8x128xf32>
    tpu.vector_store %arg8[%c0_17, %c0_18], %22 {strides = array<i32>} : memref<8x128xf32, #tpu.memory_space<vmem>>, vector<8x128xf32>,
    return
  }
  func.func @transform_0(%arg0: i32) -> (i32, i32) {
    %c0_i32 = arith.constant 0 : i32
    %c0_i32_0 = arith.constant 0 : i32
    return %arg0, %c0_i32 : i32, i32
  }
  func.func @transform_1(%arg0: i32) -> (i32, i32) {
    %c0_i32 = arith.constant 0 : i32
    %c0_i32_0 = arith.constant 0 : i32
    %c0_i32_1 = arith.constant 0 : i32
    return %c0_i32, %c0_i32_0 : i32, i32
  }
  func.func @transform_2(%arg0: i32) -> (i32, i32) {
    %c0_i32 = arith.constant 0 : i32
    %c0_i32_0 = arith.constant 0 : i32
    %c0_i32_1 = arith.constant 0 : i32
    return %c0_i32, %c0_i32_0 : i32, i32
  }
  func.func @transform_3(%arg0: i32) -> (i32, i32) {
    %c0_i32 = arith.constant 0 : i32
    %c0_i32_0 = arith.constant 0 : i32
    %c0_i32_1 = arith.constant 0 : i32
    return %c0_i32, %c0_i32_0 : i32, i32
  }
  func.func @transform_4(%arg0: i32) -> (i32, i32) {
    %c0_i32 = arith.constant 0 : i32
    %c0_i32_0 = arith.constant 0 : i32
    %c0_i32_1 = arith.constant 0 : i32
    return %c0_i32, %c0_i32_0 : i32, i32
  }
  func.func @transform_5(%arg0: i32) -> (i32, i32) {
    %c0_i32 = arith.constant 0 : i32
    %c0_i32_0 = arith.constant 0 : i32
    %c0_i32_1 = arith.constant 0 : i32
    return %c0_i32, %c0_i32_0 : i32, i32
  }
  func.func @transform_6(%arg0: i32) -> (i32, i32) {
    %c0_i32 = arith.constant 0 : i32
    %c0_i32_0 = arith.constant 0 : i32
    %c0_i32_1 = arith.constant 0 : i32
    return %c0_i32, %c0_i32_0 : i32, i32
  }
  func.func @transform_7(%arg0: i32) -> (i32, i32) {
    %c0_i32 = arith.constant 0 : i32
    %c0_i32_0 = arith.constant 0 : i32
    return %c0_i32, %arg0 : i32, i32
  }
}

</mosaic_0001>

<bundles_post_ra>
// kernel: policy_net_forward.1
= control target key start
LH: loop header
LB: loop body
LE: loop exit
PB: predicated region body
PF: predicated region fallthrough
CT: control target
= control target key end

     0   :  { %vm127_vm0 = vcmask 48128   ;;  %v577_v3 = vmov 0   ;;  %vm317_vm1 = vcmask 523264   ;;  %vm579_vm2 = vmmov 0   ;;  %s774_s0 = inlined_call_operand.vmem [shape: f32[128,6], index: 0, kind: input, shape index: {}]   ;;  %s775_s1 = inlined_call_operand.vmem [shape: bf16[64,6], index: 1, kind: input, shape index: {}]   ;;  %s776_s2 = inlined_call_operand.vmem [shape: f32[64,1], index: 2, kind: input, shape index: {}]   ;;  %s777_s4 = inlined_call_operand.vmem [shape: f32[64,1], index: 4, kind: input, shape index: {}]   ;;  %s778_s6 = inlined_call_operand.vmem [shape: f32[8,1], index: 6, kind: input, shape index: {}]   ;;  %s779_s3 = inlined_call_operand.vmem [shape: bf16[64,64], index: 3, kind: input, shape index: {}]   ;;  %s780_s5 = inlined_call_operand.vmem [shape: bf16[8,64], index: 5, kind: input, shape index: {}]   ;;  %s781_s7 = inlined_call_operand.vmem [shape: f32[8,128], index: 7, kind: output, shape index: {}]  }
   0x1   :  { %v41_v0 = vld [vmem:[%s774_s0 + $0x70] sm:$0xff]  ;;  %v42_v1 = vld [vmem:[%s774_s0 + $0x78] sm:$0xff]  ;;  %v39_v2 = vld [vmem:[%s774_s0 + $0x60] sm:$0xff]  ;;  %567 = vset.pattern.permute.xlu0 %v577_v3  ;;  %568 = vset.pattern.permute.xlu1 %v577_v3 }
   0x2   :  { %v50_v4 = vpack.c.bf16 %v42_v1, %v41_v0  ;;  %v40_v5 = vld [vmem:[%s774_s0 + $0x68] sm:$0xff]  ;;  %v37_v8 = vld [vmem:[%s774_s0 + $0x50] sm:$0xff]  ;;  %v38_v9 = vld [vmem:[%s774_s0 + $0x58] sm:$0xff] }
   0x3   :  { %v49_v6 = vpack.c.bf16 %v40_v5, %v39_v2  ;;  %v569_v10 = vld [vmem:[%s775_s1] sm:$0xff]   ;;  %v48_v12 = vpack.c.bf16 %v38_v9, %v37_v8  ;;  %v65_v13 = vld [vmem:[%s776_s2 + $0x30] sm:$0xff]  ;;  %v66_v15 = vld [vmem:[%s776_s2 + $0x38] sm:$0xff] }
   0x4   :  { %556 = vmatprep.subr.msk.bf16.mxu0 %vm127_vm0, %v50_v4  ;;  %v162_v7 = vsel %vm127_vm0, %v50_v4, 0  ;;  %520 = vmatprep.mubr.msk.bf16.mxu0 %vm127_vm0, %v569_v10  ;;  %v63_v14 = vld [vmem:[%s776_s2 + $0x20] sm:$0xff]  ;;  %v64_v16 = vld [vmem:[%s776_s2 + $0x28] sm:$0xff]  ;;  %v61_v19 = vld [vmem:[%s776_s2 + $0x10] sm:$0xff] }
   0x5   :  { %505 = vmatpush3.bf16.xpose.msra.mxu0 %v162_v7  ;;  %v159_v11 = vsel %vm127_vm0, %v49_v6, 0  ;;  %99 = vperm.xlu0 %567, %v65_v13   ;;  %v35_v17 = vld [vmem:[%s774_s0 + $0x40] sm:$0xff]  ;;  %v36_v18 = vld [vmem:[%s774_s0 + $0x48] sm:$0xff]  ;;  %v62_v20 = vld [vmem:[%s776_s2 + $0x18] sm:$0xff]  ;;  %v156_v21 = vsel %vm127_vm0, %v48_v12, 0 }
   0x6   :  { %557 = vmatprep.subr.msk.bf16.mxu0 %vm127_vm0, %v49_v6  ;;  %89 = vperm.xlu1 %568, %v63_v14   ;;  %v47_v22 = vpack.c.bf16 %v36_v18, %v35_v17  ;;  %v59_v23 = vld [vmem:[%s776_s2] sm:$0xff]  ;;  %v60_v24 = vld [vmem:[%s776_s2 + $0x8] sm:$0xff]  ;;  %v33_v25 = vld [vmem:[%s774_s0 + $0x30] sm:$0xff] }
   0x7   :  { %v34_v26 = vld [vmem:[%s774_s0 + $0x38] sm:$0xff]  ;;  %v255_v27 = vld [vmem:[%s777_s4 + $0x30] sm:$0xff]  ;;  %v253_v31 = vld [vmem:[%s777_s4 + $0x20] sm:$0xff] }
   0x8   :  { %v256_v28 = vld [vmem:[%s777_s4 + $0x38] sm:$0xff]  ;;  %v153_v29 = vsel %vm127_vm0, %v47_v22, 0  ;;  %v46_v30 = vpack.c.bf16 %v34_v26, %v33_v25  ;;  %v254_v32 = vld [vmem:[%s777_s4 + $0x28] sm:$0xff]  ;;  %v31_v33 = vld [vmem:[%s774_s0 + $0x20] sm:$0xff] }
   0x9   :  { %104 = vperm.xlu0 %567, %v66_v15   ;;  %v32_v34 = vld [vmem:[%s774_s0 + $0x28] sm:$0xff]  ;;  %v251_v35 = vld [vmem:[%s777_s4 + $0x10] sm:$0xff]  ;;  %v252_v36 = vld [vmem:[%s777_s4 + $0x18] sm:$0xff] }
   0xa   :  { %94 = vperm.xlu1 %568, %v64_v16   ;;  %v150_v37 = vsel %vm127_vm0, %v46_v30, 0  ;;  %v45_v38 = vpack.c.bf16 %v32_v34, %v31_v33  ;;  %v249_v39 = vld [vmem:[%s777_s4] sm:$0xff]  ;;  %v250_v40 = vld [vmem:[%s777_s4 + $0x8] sm:$0xff]  ;;  %v29_v41 = vld [vmem:[%s774_s0 + $0x10] sm:$0xff] }
   0xb   :  { %v30_v42 = vld [vmem:[%s774_s0 + $0x18] sm:$0xff]  ;;  %v408_v43 = vld [vmem:[%s778_s6] sm:$0xff]  ;;  %v28_v47 = vld [vmem:[%s774_s0 + $0x8] sm:$0xff] }
   0xc   :  { %v147_v44 = vsel %vm127_vm0, %v45_v38, 0  ;;  %v44_v45 = vpack.c.bf16 %v30_v42, %v29_v41  ;;  %v27_v46 = vld [vmem:[%s774_s0] sm:$0xff]  ;;  %v570_v51 = vld [vmem:[%s775_s1 + $0x8] sm:$0xff]   ;;  %v571_v52 = vld [vmem:[%s775_s1 + $0x10] sm:$0xff]  }
   0xd   :  { %507 = vmatpush3.bf16.xpose.msra.mxu0 %v159_v11  ;;  %79 = vperm.xlu0 %567, %v61_v19   ;;  %v43_v49 = vpack.c.bf16 %v28_v47, %v27_v46  ;;  %v572_v53 = vld [vmem:[%s775_s1 + $0x18] sm:$0xff]   ;;  %v573_v54 = vld [vmem:[%s779_s3] sm:$0xff]  }
   0xe   :  { %558 = vmatprep.subr.msk.bf16.mxu0 %vm127_vm0, %v48_v12  ;;  %84 = vperm.xlu1 %568, %v62_v20   ;;  %v144_v48 = vsel %vm127_vm0, %v44_v45, 0 }
   0xf   :  { %v141_v50 = vsel %vm127_vm0, %v43_v49, 0  ;;  %536 = vmatprep.mubr.msk.bf16.mxu1 %vm317_vm1, %v573_v54 }
  0x11   :  { %69 = vperm.xlu0 %567, %v59_v23  }
  0x12   :  { %74 = vperm.xlu1 %568, %v60_v24  }
  0x15   :  { %509 = vmatpush3.bf16.xpose.msra.mxu0 %v156_v21  ;;  %289 = vperm.xlu0 %567, %v255_v27   ;;  %v574_v27 = vld [vmem:[%s779_s3 + $0x8] sm:$0xff]  }
  0x16   :  { %559 = vmatprep.subr.msk.bf16.mxu0 %vm127_vm0, %v47_v22  ;;  %294 = vperm.xlu1 %568, %v256_v28   ;;  %v575_v28 = vld [vmem:[%s779_s3 + $0x10] sm:$0xff]  }
  0x19   :  { %279 = vperm.xlu0 %567, %v253_v31  }
  0x1a   :  { %284 = vperm.xlu1 %568, %v254_v32  }
  0x1d   :  { %511 = vmatpush3.bf16.xpose.msra.mxu0 %v153_v29  ;;  %269 = vperm.xlu0 %567, %v251_v35   ;;  %v576_v29 = vld [vmem:[%s779_s3 + $0x18] sm:$0xff]  }
  0x1e   :  { %560 = vmatprep.subr.msk.bf16.mxu0 %vm127_vm0, %v46_v30  ;;  %274 = vperm.xlu1 %568, %v252_v36   ;;  %v578_v30 = vmov 0.0  }
  0x21   :  { %259 = vperm.xlu0 %567, %v249_v39  }
  0x22   :  { %264 = vperm.xlu1 %568, %v250_v40  }
  0x25   :  { %513 = vmatpush3.bf16.xpose.msra.mxu0 %v150_v37  ;;  %411 = vperm.xlu0 %567, %v408_v43  }
  0x26   :  { %561 = vmatprep.subr.msk.bf16.mxu0 %vm127_vm0, %v45_v38 }
  0x2d   :  { %515 = vmatpush3.bf16.xpose.msra.mxu0 %v147_v44 }
  0x2e   :  { %562 = vmatprep.subr.msk.bf16.mxu0 %vm127_vm0, %v44_v45 }
  0x35   :  { %517 = vmatpush3.bf16.xpose.msra.mxu0 %v144_v48 }
  0x36   :  { %563 = vmatprep.subr.msk.bf16.mxu0 %vm127_vm0, %v43_v49 }
  0x3d   :  { %519 = vmatpush3.bf16.xpose.msra.mxu0 %v141_v50 }
  0x44   :  { %521 = vmatmul.mubr.msk.bf16.vlgmr.msra.gmra.mxu0 %vm127_vm0, %v570_v51 }
  0x45   :  { %524 = vmatprep.mubr.msk.bf16.mxu0 %vm127_vm0, %v571_v52 }
  0x4c   :  { %525 = vmatmul.mubr.msk.bf16.gmra.mxu0 %vm127_vm0, %v572_v53 }
  0x80   :  { %v100_v57 = vpop.permute.xlu0 %99 }
  0x81   :  { %v90_v55 = vpop.permute.xlu1 %89 }
  0x84   :  { %v105_v62 = vpop.permute.xlu0 %104 }
  0x85   :  { %v95_v60 = vpop.permute.xlu1 %94 }
  0x88   :  { %v80_v6 = vpop.permute.xlu0 %79 }
  0x89   :  { %v85_v2 = vpop.permute.xlu1 %84 }
  0x8c   :  { %v70_v20 = vpop.permute.xlu0 %69 }
  0x8d   :  { %v75_v16 = vpop.permute.xlu1 %74 }
  0x90   :  { %v290_v34 = vpop.permute.xlu0 %289 }
  0x91   :  { %v295_v32 = vpop.permute.xlu1 %294 }
  0x94   :  { %v280_v39 = vpop.permute.xlu0 %279 }
  0x95   :  { %v285_v37 = vpop.permute.xlu1 %284 }
  0x98   :  { %v270_v50 = vpop.permute.xlu0 %269 }
  0x99   :  { %v275_v44 = vpop.permute.xlu1 %274 }
 0x104   :  { %v522_v56 = vpop.f32.mrf.mxu0 }
 0x105   :  { %v207_v12 = vadd.f32 %v522_v56, %v80_v6  ;;  %v265_v56 = vpop.permute.xlu1 %264 }
 0x106   :  { %v198_v58 = vpop.f32.mrf.mxu0 }
 0x107   :  { %v231_v21 = vmax.f32 %v207_v12, 0.0  ;;  %v199_v22 = vadd.f32 %v198_v58, %v70_v20 }
 0x108   :  { %v523_v59 = vpop.f32.mrf.mxu0 }
 0x109   :  { %v210_v8 = vadd.f32 %v523_v59, %v85_v2  ;;  %v229_v25 = vmax.f32 %v199_v22, 0.0 }
 0x10a   :  { %v201_v61 = vpop.f32.mrf.mxu0 }
 0x10b   :  { %v232_v17 = vmax.f32 %v210_v8, 0.0  ;;  %v202_v18 = vadd.f32 %v201_v61, %v75_v16 }
 0x10c   :  { %v526_v63 = vpop.f32.mrf.mxu0 }
 0x10d   :  { %v223_v1 = vadd.f32 %v526_v63, %v100_v57  ;;  %v238_v23 = vpack.c.bf16 %v232_v17, %v231_v21  ;;  %v230_v24 = vmax.f32 %v202_v18, 0.0 }
 0x10e   :  { %v214_v0 = vpop.f32.mrf.mxu0 }
 0x10f   :  { %v215_v4 = vadd.f32 %v214_v0, %v90_v55  ;;  %v235_v9 = vmax.f32 %v223_v1, 0.0  ;;  %v237_v26 = vpack.c.bf16 %v230_v24, %v229_v25 }
 0x110   :  { %v527_v3 = vpop.f32.mrf.mxu0 }
 0x111   :  { %v226_v5 = vadd.f32 %v527_v3, %v105_v62  ;;  %v233_v13 = vmax.f32 %v215_v4, 0.0  ;;  %v407_v3 = vld [vmem:[%s780_s5] sm:$0xf] }
 0x112   :  { %v217_v7 = vpop.f32.mrf.mxu0 }
 0x113   :  { %v236_v10 = vmax.f32 %v226_v5, 0.0  ;;  %v218_v11 = vadd.f32 %v217_v7, %v95_v60  ;;  %v260_v60 = vpop.permute.xlu0 %259 }
 0x115   :  { %v234_v14 = vmax.f32 %v218_v11, 0.0  ;;  %v240_v15 = vpack.c.bf16 %v236_v10, %v235_v9 }
 0x117   :  { %v239_v19 = vpack.c.bf16 %v234_v14, %v233_v13  ;;  %528 = vmatprep.subr.bf16.mxu1 %v240_v15  ;;  %v412_v4 = vpop.permute.xlu0 %411 }
 0x118   :  { %529 = vmatpush3.bf16.msra.mxu1 %v240_v15 }
 0x119   :  { %530 = vmatprep.subr.bf16.mxu1 %v239_v19 }
 0x11c   :  { %531 = vmatpush3.bf16.msra.mxu1 %v239_v19 }
 0x11d   :  { %532 = vmatprep.subr.bf16.mxu1 %v238_v23 }
 0x120   :  { %533 = vmatpush3.bf16.msra.mxu1 %v238_v23 }
 0x121   :  { %534 = vmatprep.subr.bf16.mxu1 %v237_v26 }
 0x124   :  { %535 = vmatpush3.bf16.msra.mxu1 %v237_v26 }
 0x125   :  { %544 = vmatprep.subr.bf16.mxu1 %v578_v30 }
 0x127   :  { %537 = vmatmul.mubr.msk.bf16.vlgmr.msra.gmra.mxu1 %vm317_vm1, %v574_v27 }
 0x128   :  { %540 = vmatprep.mubr.msk.bf16.mxu1 %vm317_vm1, %v575_v28 }
 0x12f   :  { %541 = vmatmul.mubr.msk.bf16.gmra.mxu1 %vm317_vm1, %v576_v29 }
 0x130   :  { %552 = vmatprep.mubr.msk.bf16.mxu1 %vm579_vm2, %v578_v30 }
 0x1e7   :  { %v538_v31 = vpop.f32.mrf.mxu1 }
 0x1e8   :  { %v373_v54 = vadd.f32 %v538_v31, %v270_v50 }
 0x1e9   :  { %v364_v33 = vpop.f32.mrf.mxu1 }
 0x1ea   :  { %v397_v61 = vmax.f32 %v373_v54, 0.0  ;;  %v365_v62 = vadd.f32 %v364_v33, %v260_v60 }
 0x1eb   :  { %v539_v35 = vpop.f32.mrf.mxu1 }
 0x1ec   :  { %v376_v51 = vadd.f32 %v539_v35, %v275_v44  ;;  %v395_v1 = vmax.f32 %v365_v62, 0.0 }
 0x1ed   :  { %v367_v36 = vpop.f32.mrf.mxu1 }
 0x1ee   :  { %v398_v57 = vmax.f32 %v376_v51, 0.0  ;;  %v368_v58 = vadd.f32 %v367_v36, %v265_v56 }
 0x1ef   :  { %v542_v38 = vpop.f32.mrf.mxu1 }
 0x1f0   :  { %v389_v41 = vadd.f32 %v542_v38, %v290_v34  ;;  %v404_v63 = vpack.c.bf16 %v398_v57, %v397_v61  ;;  %v396_v0 = vmax.f32 %v368_v58, 0.0 }
 0x1f1   :  { %v380_v40 = vpop.f32.mrf.mxu1 }
 0x1f2   :  { %v401_v46 = vmax.f32 %v389_v41, 0.0  ;;  %v381_v47 = vadd.f32 %v380_v40, %v280_v39  ;;  %v403_v2 = vpack.c.bf16 %v396_v0, %v395_v1 }
 0x1f3   :  { %v543_v42 = vpop.f32.mrf.mxu1 }
 0x1f4   :  { %v392_v43 = vadd.f32 %v543_v42, %v295_v32  ;;  %v399_v55 = vmax.f32 %v381_v47, 0.0 }
 0x1f5   :  { %v383_v45 = vpop.f32.mrf.mxu1 }
 0x1f6   :  { %v402_v48 = vmax.f32 %v392_v43, 0.0  ;;  %v384_v49 = vadd.f32 %v383_v45, %v285_v37 }
 0x1f8   :  { %v406_v52 = vpack.c.bf16 %v402_v48, %v401_v46  ;;  %v400_v53 = vmax.f32 %v384_v49, 0.0 }
 0x1fa   :  { %545 = vmatpush3.bf16.msra.mxu1 %v406_v52  ;;  %v405_v59 = vpack.c.bf16 %v400_v53, %v399_v55 }
 0x1fb   :  { %546 = vmatprep.subr.bf16.mxu1 %v578_v30 }
 0x1fe   :  { %547 = vmatpush3.bf16.msra.mxu1 %v405_v59 }
 0x1ff   :  { %548 = vmatprep.subr.bf16.mxu1 %v578_v30 }
 0x202   :  { %549 = vmatpush3.bf16.msra.mxu1 %v404_v63 }
 0x203   :  { %550 = vmatprep.subr.bf16.mxu1 %v578_v30 }
 0x206   :  { %551 = vmatpush3.bf16.msra.mxu1 %v403_v2 }
 0x209   :  { %553 = vmatmul.mubr.msk.bf16.vlgmr.msra.gmra.mxu1 %vm317_vm1, %v407_v3 }
 0x2c9   :  { %v451_v5 = vpop.f32.mrf.mxu1 }
 0x2ca   :  { %v452_v6 = vadd.f32 %v451_v5, %v412_v4 }
 0x2cb   :  { %v554_v7 = vpop.f32.mrf.mxu1 }
 0x2cc   :  { %457 = vst [vmem:[%s781_s7] sm:$0xff] %v452_v6 }
 0x2cd   :  { %v454_v8 = vpop.f32.mrf.mxu1 }
 0x2cf   :  { %v555_v9 = vpop.f32.mrf.mxu1 }

</bundles_post_ra>
